<compile_context>
chip_gen: v7x
topology: tpu7x:2x2x1
jax: 0.10.0
libtpu: 0.0.40
codegen_flags: <defaults>
</compile_context>

<pallas_src>
import jax
import jax.numpy as jnp
from jax.experimental import pallas as pl
from jax.experimental.pallas import tpu as pltpu


HIDDEN_PAD = 256   # 200 -> 2 * 128
D_OUT_PAD = 128    # 10  -> 1 * 128


def _round_up(n, m):
    return (n + m - 1) // m * m


def _mlp_kernel(x_ref, w1_ref, b1_ref, w2_ref, b2_ref, w3_ref, b3_ref, o_ref):
    # Cast x to bf16 in-kernel (hidden under DMA/MXU) instead of a wrapper copy.
    x = x_ref[...].astype(jnp.bfloat16)
    # fc1 + ReLU (MXU matmul, f32 accumulation, f32 bias)
    h1 = jnp.dot(x, w1_ref[...], preferred_element_type=jnp.float32) + b1_ref[...]
    h1 = jnp.maximum(h1, 0.0).astype(jnp.bfloat16)
    # fc2 + ReLU
    h2 = jnp.dot(h1, w2_ref[...], preferred_element_type=jnp.float32) + b2_ref[...]
    h2 = jnp.maximum(h2, 0.0).astype(jnp.bfloat16)
    # fc3 (no activation); lane-dense (tb, 128) bf16 store
    o_ref[...] = (
        jnp.dot(h2, w3_ref[...], preferred_element_type=jnp.float32) + b3_ref[...]
    ).astype(o_ref.dtype)


def mnist_2nn_forward(x, params, *, output_size=10, block_b=2048):
    """x: (B, C, H, W) or (B, D).  Returns (B, output_size) float32 logits."""
    w1, b1, w2, b2, w3, b3 = params
    d_in = w1.shape[0]        # 784 (unpadded contraction dim)
    hid_pad = w1.shape[1]     # 256
    d_out_pad = w3.shape[1]   # 128

    batch = x.shape[0]
    x2d = x.reshape(batch, -1)                 # x.view(B, -1), native dtype
    assert x2d.shape[1] == d_in, (x2d.shape, d_in)

    # Batch tiling: 16-aligned tiles; prefer >=2 grid steps (v7x megacore).
    block_b = _round_up(max(block_b, 16), 16)
    aligned_batch = _round_up(batch, 16)
    tb = min(block_b, aligned_batch)
    if tb == aligned_batch and aligned_batch >= 32:
        tb = _round_up(aligned_batch // 2, 16)
    padded_batch = _round_up(batch, tb)
    if padded_batch != batch:
        x2d = jnp.pad(x2d, ((0, padded_batch - batch), (0, 0)))

    # Weights stream as bf16 (tiny, resident in VMEM); biases stay f32.
    w1b = w1.astype(jnp.bfloat16)
    w2b = w2.astype(jnp.bfloat16)
    w3b = w3.astype(jnp.bfloat16)
    b1f = b1.astype(jnp.float32)
    b2f = b2.astype(jnp.float32)
    b3f = b3.astype(jnp.float32)

    grid = (padded_batch // tb,)

    flops = 2 * padded_batch * (
        d_in * hid_pad + hid_pad * hid_pad + hid_pad * d_out_pad)
    bytes_accessed = (
        padded_batch * d_in * x2d.dtype.itemsize                       # x
        + (d_in * hid_pad + hid_pad * hid_pad + hid_pad * d_out_pad) * 2  # weights (bf16)
        + (hid_pad + hid_pad + d_out_pad) * 4                          # biases (f32)
        + padded_batch * d_out_pad * 2                                 # out (bf16)
    )

    out_padded = pl.pallas_call(
        _mlp_kernel,
        out_shape=jax.ShapeDtypeStruct((padded_batch, d_out_pad), jnp.bfloat16),
        grid_spec=pltpu.PrefetchScalarGridSpec(
            num_scalar_prefetch=0,
            grid=grid,
            in_specs=[
                # x: streamed per batch tile, full (unpadded) feature dim.
                pl.BlockSpec((tb, d_in), lambda i: (i, 0)),
                # weights / biases: same block every step -> resident in VMEM.
                pl.BlockSpec((d_in, hid_pad), lambda i: (0, 0)),
                pl.BlockSpec((1, hid_pad), lambda i: (0, 0)),
                pl.BlockSpec((hid_pad, hid_pad), lambda i: (0, 0)),
                pl.BlockSpec((1, hid_pad), lambda i: (0, 0)),
                pl.BlockSpec((hid_pad, d_out_pad), lambda i: (0, 0)),
                pl.BlockSpec((1, d_out_pad), lambda i: (0, 0)),
            ],
            out_specs=pl.BlockSpec((tb, d_out_pad), lambda i: (i, 0)),
        ),
        compiler_params=pltpu.CompilerParams(
            dimension_semantics=("parallel",),
            vmem_limit_bytes=32 << 20,
        ),
        cost_estimate=pl.CostEstimate(
            flops=int(flops), transcendentals=0,
            bytes_accessed=int(bytes_accessed)),
    )(x2d, w1b, b1f, w2b, b2f, w3b, b3f)

    # Slice padded batch rows / padded logit columns; upcast bf16 -> f32.
    return out_padded[:batch, :output_size].astype(jnp.float32)


def init_params(key, input_size=784, hidden=200, output_size=10):
    """PyTorch nn.Linear-style init (U[-1/sqrt(fan_in), 1/sqrt(fan_in)]), stored
    as (in_features, out_features).  Only output dims are zero-padded to
    lane-aligned sizes; the contraction dim of fc1 stays at input_size."""
    keys = jax.random.split(key, 6)

    def linear(kw, kb, fan_in, fan_out, pad_in, pad_out):
        bound = 1.0 / jnp.sqrt(jnp.float32(fan_in))
        w = jax.random.uniform(kw, (fan_in, fan_out), jnp.float32, -bound, bound)
        b = jax.random.uniform(kb, (1, fan_out), jnp.float32, -bound, bound)
        w = jnp.pad(w, ((0, pad_in - fan_in), (0, pad_out - fan_out)))
        b = jnp.pad(b, ((0, 0), (0, pad_out - fan_out)))
        return w, b

    hid_pad = _round_up(hidden, 128)
    out_pad = _round_up(max(output_size, 128), 128)

    w1, b1 = linear(keys[0], keys[1], input_size, hidden, input_size, hid_pad)
    w2, b2 = linear(keys[2], keys[3], hidden, hidden, hid_pad, hid_pad)
    w3, b3 = linear(keys[4], keys[5], hidden, output_size, hid_pad, out_pad)
    return (w1, b1, w2, b2, w3, b3)


def _reference_forward(x, params, output_size=10):
    """Plain-JAX f32 reference (padded output dims are exactly zero, so the
    first `output_size` columns match the unpadded PyTorch module)."""
    w1, b1, w2, b2, w3, b3 = params
    h = x.reshape(x.shape[0], -1).astype(jnp.float32)
    h = jnp.maximum(h @ w1 + b1, 0.0)
    h = jnp.maximum(h @ w2 + b2, 0.0)
    return (h @ w3 + b3)[:, :output_size]


if __name__ == "__main__":
    key = jax.random.PRNGKey(0)
    k_x, k_p = jax.random.split(key)

    # MNIST-like input: batch=2, NCHW (2, 1, 28, 28) -> flattened to 784.
    x = jax.random.normal(k_x, (2, 1, 28, 28), dtype=jnp.float32)
    params = init_params(k_p, input_size=784, hidden=200, output_size=10)

    out = mnist_2nn_forward(x, params, output_size=10)
    out = jax.block_until_ready(out)

    ref = _reference_forward(x, params, output_size=10)
    assert out.shape == (2, 10), out.shape
    # bf16 activations/weights + bf16 output store (f32 accumulation) -> loose tol.
    assert jnp.allclose(out, ref, atol=3e-2, rtol=3e-2), "mismatch vs reference"

    print("KERNEL_OK")
</pallas_src>

<mosaic_0001>
module attributes {stable_mosaic.version = 11 : i64} {
  func.func @_mlp_kernel(%arg0: i32, %arg1: memref<16x784xf32, #tpu.memory_space<vmem>>, %arg2: memref<784x256xbf16, #tpu.memory_space<vmem>>, %arg3: memref<1x256xf32, #tpu.memory_space<vmem>>, %arg4: memref<256x256xbf16, #tpu.memory_space<vmem>>, %arg5: memref<1x256xf32, #tpu.memory_space<vmem>>, %arg6: memref<256x128xbf16, #tpu.memory_space<vmem>>, %arg7: memref<1x128xf32, #tpu.memory_space<vmem>>, %arg8: memref<16x128xbf16, #tpu.memory_space<vmem>>) attributes {dimension_semantics = [#tpu.dimension_semantics<parallel>], iteration_bounds = array<i64: 1>, scalar_prefetch = 0 : i64, scratch_operands = 0 : i64, tpu.core_type = #tpu.core_type<tc>, window_params = [{transform_indices = @transform_0, window_bounds = array<i64: 16, 784>}, {pipeline_mode = #tpu.pipeline_mode<synchronous>, transform_indices = @transform_1, window_bounds = array<i64: 784, 256>}, {pipeline_mode = #tpu.pipeline_mode<synchronous>, transform_indices = @transform_2, window_bounds = array<i64: 1, 256>}, {pipeline_mode = #tpu.pipeline_mode<synchronous>, transform_indices = @transform_3, window_bounds = array<i64: 256, 256>}, {pipeline_mode = #tpu.pipeline_mode<synchronous>, transform_indices = @transform_4, window_bounds = array<i64: 1, 256>}, {pipeline_mode = #tpu.pipeline_mode<synchronous>, transform_indices = @transform_5, window_bounds = array<i64: 256, 128>}, {pipeline_mode = #tpu.pipeline_mode<synchronous>, transform_indices = @transform_6, window_bounds = array<i64: 1, 128>}, {transform_indices = @transform_7, window_bounds = array<i64: 16, 128>}]} {
    %c0 = arith.constant 0 : index
    %c0_0 = arith.constant 0 : index
    %0 = vector.load %arg1[%c0, %c0_0] : memref<16x784xf32, #tpu.memory_space<vmem>>, vector<16x784xf32>
    %1 = arith.truncf %0 : vector<16x784xf32> to vector<16x784xbf16>
    %c0_1 = arith.constant 0 : index
    %c0_2 = arith.constant 0 : index
    %2 = vector.load %arg2[%c0_1, %c0_2] : memref<784x256xbf16, #tpu.memory_space<vmem>>, vector<784x256xbf16>
    %cst = arith.constant dense<0.000000e+00> : vector<16x256xf32>
    %3 = tpu.matmul %1, %2, %cst {dimension_numbers = #tpu.dot_dimension_numbers<[1], [0], [0], [1], [0, 0, 1, 1], [], []>} : vector<16x784xbf16>, vector<784x256xbf16>, vector<16x256xf32> -> vector<16x256xf32>
    %c0_3 = arith.constant 0 : index
    %c0_4 = arith.constant 0 : index
    %4 = vector.load %arg3[%c0_3, %c0_4] : memref<1x256xf32, #tpu.memory_space<vmem>>, vector<1x256xf32>
    %5 = vector.broadcast %4 : vector<1x256xf32> to vector<16x256xf32>
    %6 = arith.addf %3, %5 : vector<16x256xf32>
    %cst_5 = arith.constant 0.000000e+00 : f32
    %7 = vector.broadcast %cst_5 : f32 to vector<16x256xf32>
    %8 = arith.maximumf %6, %7 : vector<16x256xf32>
    %9 = arith.truncf %8 : vector<16x256xf32> to vector<16x256xbf16>
    %c0_6 = arith.constant 0 : index
    %c0_7 = arith.constant 0 : index
    %10 = vector.load %arg4[%c0_6, %c0_7] : memref<256x256xbf16, #tpu.memory_space<vmem>>, vector<256x256xbf16>
    %cst_8 = arith.constant dense<0.000000e+00> : vector<16x256xf32>
    %11 = tpu.matmul %9, %10, %cst_8 {dimension_numbers = #tpu.dot_dimension_numbers<[1], [0], [0], [1], [0, 0, 1, 1], [], []>} : vector<16x256xbf16>, vector<256x256xbf16>, vector<16x256xf32> -> vector<16x256xf32>
    %c0_9 = arith.constant 0 : index
    %c0_10 = arith.constant 0 : index
    %12 = vector.load %arg5[%c0_9, %c0_10] : memref<1x256xf32, #tpu.memory_space<vmem>>, vector<1x256xf32>
    %13 = vector.broadcast %12 : vector<1x256xf32> to vector<16x256xf32>
    %14 = arith.addf %11, %13 : vector<16x256xf32>
    %cst_11 = arith.constant 0.000000e+00 : f32
    %15 = vector.broadcast %cst_11 : f32 to vector<16x256xf32>
    %16 = arith.maximumf %14, %15 : vector<16x256xf32>
    %17 = arith.truncf %16 : vector<16x256xf32> to vector<16x256xbf16>
    %c0_12 = arith.constant 0 : index
    %c0_13 = arith.constant 0 : index
    %18 = vector.load %arg6[%c0_12, %c0_13] : memref<256x128xbf16, #tpu.memory_space<vmem>>, vector<256x128xbf16>
    %cst_14 = arith.constant dense<0.000000e+00> : vector<16x128xf32>
    %19 = tpu.matmul %17, %18, %cst_14 {dimension_numbers = #tpu.dot_dimension_numbers<[1], [0], [0], [1], [0, 0, 1, 1], [], []>} : vector<16x256xbf16>, vector<256x128xbf16>, vector<16x128xf32> -> vector<16x128xf32>
    %c0_15 = arith.constant 0 : index
    %c0_16 = arith.constant 0 : index
    %20 = vector.load %arg7[%c0_15, %c0_16] : memref<1x128xf32, #tpu.memory_space<vmem>>, vector<1x128xf32>
    %21 = vector.broadcast %20 : vector<1x128xf32> to vector<16x128xf32>
    %22 = arith.addf %19, %21 : vector<16x128xf32>
    %23 = arith.truncf %22 : vector<16x128xf32> to vector<16x128xbf16>
    %c0_17 = arith.constant 0 : index
    %c0_18 = arith.constant 0 : index
    %24 = vector.load %arg8[%c0_17, %c0_18] : memref<16x128xbf16, #tpu.memory_space<vmem>>, vector<16x128xbf16>
    tpu.vector_store %arg8[%c0_17, %c0_18], %23 {strides = array<i32>} : memref<16x128xbf16, #tpu.memory_space<vmem>>, vector<16x128xbf16>,
    return
  }
  func.func @transform_0(%arg0: i32) -> (i32, i32) {
    %c0_i32 = arith.constant 0 : i32
    %c0_i32_0 = arith.constant 0 : i32
    return %arg0, %c0_i32 : i32, i32
  }
  func.func @transform_1(%arg0: i32) -> (i32, i32) {
    %c0_i32 = arith.constant 0 : i32
    %c0_i32_0 = arith.constant 0 : i32
    %c0_i32_1 = arith.constant 0 : i32
    return %c0_i32, %c0_i32_0 : i32, i32
  }
  func.func @transform_2(%arg0: i32) -> (i32, i32) {
    %c0_i32 = arith.constant 0 : i32
    %c0_i32_0 = arith.constant 0 : i32
    %c0_i32_1 = arith.constant 0 : i32
    return %c0_i32, %c0_i32_0 : i32, i32
  }
  func.func @transform_3(%arg0: i32) -> (i32, i32) {
    %c0_i32 = arith.constant 0 : i32
    %c0_i32_0 = arith.constant 0 : i32
    %c0_i32_1 = arith.constant 0 : i32
    return %c0_i32, %c0_i32_0 : i32, i32
  }
  func.func @transform_4(%arg0: i32) -> (i32, i32) {
    %c0_i32 = arith.constant 0 : i32
    %c0_i32_0 = arith.constant 0 : i32
    %c0_i32_1 = arith.constant 0 : i32
    return %c0_i32, %c0_i32_0 : i32, i32
  }
  func.func @transform_5(%arg0: i32) -> (i32, i32) {
    %c0_i32 = arith.constant 0 : i32
    %c0_i32_0 = arith.constant 0 : i32
    %c0_i32_1 = arith.constant 0 : i32
    return %c0_i32, %c0_i32_0 : i32, i32
  }
  func.func @transform_6(%arg0: i32) -> (i32, i32) {
    %c0_i32 = arith.constant 0 : i32
    %c0_i32_0 = arith.constant 0 : i32
    %c0_i32_1 = arith.constant 0 : i32
    return %c0_i32, %c0_i32_0 : i32, i32
  }
  func.func @transform_7(%arg0: i32) -> (i32, i32) {
    %c0_i32 = arith.constant 0 : i32
    %c0_i32_0 = arith.constant 0 : i32
    return %arg0, %c0_i32 : i32, i32
  }
}

</mosaic_0001>

<bundles_post_ra>
// kernel: tpu_custom_call.1
= control target key start
LH: loop header
LB: loop body
LE: loop exit
PB: predicated region body
PF: predicated region fallthrough
CT: control target
= control target key end

     0   :  { %12 = vsyncpa [#allocation3], 0  ;;  %s2020_s0 = inlined_call_operand.hbm [shape: f32[16,784], index: 0, kind: input, shape index: {}]   ;;  %s2021_s1 = inlined_call_operand.hbm [shape: bf16[784,256], index: 1, kind: input, shape index: {}]   ;;  %s2022_s2 = inlined_call_operand.vmem [shape: f32[1,256], index: 2, kind: input, shape index: {}]   ;;  %s2023_s3 = inlined_call_operand.hbm [shape: bf16[256,256], index: 3, kind: input, shape index: {}]   ;;  %s2024_s4 = inlined_call_operand.vmem [shape: f32[1,256], index: 4, kind: input, shape index: {}]   ;;  %s2025_s5 = inlined_call_operand.hbm [shape: bf16[256,128], index: 5, kind: input, shape index: {}]   ;;  %s2026_s6 = inlined_call_operand.vmem [shape: f32[1,128], index: 6, kind: input, shape index: {}]   ;;  %s2027_s7 = inlined_call_operand.hbm [shape: bf16[16,128], index: 7, kind: output, shape index: {}]  }
   0x1   :  { %13 = vsyncpa [#allocation6], 0 }
   0x2   :  { %14 = vsyncpa [#allocation9], 0 }
   0x3   :  { %15 = vsyncpa [#allocation4], 0  ;;  %s1880_s24 = smov [#allocation5]   ;;  %s1762_s28 = scalar_lea.hbm %s2021_s1, 12544 }
   0x4   :  { %s33_s25 = sshll.u32 %s1880_s24, 4  ;;  %p1763_p0 = scmp.ne.s32.totalorder %s2021_s1, %s1762_s28  ;;  %s34_s25 = int_to_ptr.vmem [resolvable:$true] %s33_s25 }
   0x5   :  { %p1766_p1 = scmp.lt.u32.totalorder %s1762_s28, %s2021_s1 }
   0x7   :  { %p1768_p2 = pnand %p1766_p1, %p1763_p0 }
   0x9   :  { %1771 = shalt.err (!%p1768_p2)
}
   0xa   :  { %s1772_s10 = scalar_lea.vmem %s34_s25, 12544  ;;  %p1777_p4 = scmp.lt.s32.totalorder %s34_s25, %s34_s25 }
   0xb   :  { %p1773_p3 = scmp.ne.s32.totalorder %s34_s25, %s1772_s10  ;;  %p1778_p5 = scmp.lt.s32.totalorder %s1772_s10, %s1772_s10 }
   0xd   :  { %p1779_p6 = por %p1778_p5, %p1777_p4 }
   0xf   :  { %p1780_p7 = pnand %p1779_p6, %p1773_p3 }
  0x11   :  { %1783 = shalt.err (!%p1780_p7)
}
  0x12   :  { %s1881_s11 = smov 128   ;;  %s1882_s12 = smov 8  }
  0x13   :  { %39 = dma.hbm_to_vmem [thread:$0]  %s2021_s1, 12544, %s34_s25, [#allocation6], %s1881_s11, %s1881_s11, %s1882_s12  }
  0x14   :  { %s1883_s15 = smov [#allocation2]   ;;  %s1784_s19 = scalar_lea.hbm %s2020_s0, 1792 }
  0x15   :  { %s21_s16 = sshll.u32 %s1883_s15, 4  ;;  %p1785_p8 = scmp.ne.s32.totalorder %s2020_s0, %s1784_s19  ;;  %s22_s16 = int_to_ptr.vmem [resolvable:$true] %s21_s16 }
  0x16   :  { %p1788_p9 = scmp.lt.u32.totalorder %s1784_s19, %s2020_s0 }
  0x18   :  { %p1790_p10 = pnand %p1788_p9, %p1785_p8 }
  0x1a   :  { %1793 = shalt.err (!%p1790_p10)
}
  0x1b   :  { %s1794_s24 = scalar_lea.vmem %s22_s16, 1792  ;;  %p1799_p12 = scmp.lt.s32.totalorder %s22_s16, %s22_s16 }
  0x1c   :  { %p1795_p11 = scmp.ne.s32.totalorder %s22_s16, %s1794_s24  ;;  %p1800_p13 = scmp.lt.s32.totalorder %s1794_s24, %s1794_s24 }
  0x1e   :  { %p1801_p0 = por %p1800_p13, %p1799_p12 }
  0x20   :  { %p1802_p1 = pnand %p1801_p0, %p1795_p11 }
  0x22   :  { %1805 = shalt.err (!%p1802_p1)
}
  0x23   :  { %s1884_s1 = smov 896   ;;  %s1885_s25 = smov 56  }
  0x24   :  { %27 = dma.hbm_to_vmem [thread:$0]  %s2020_s0, 1792, %s22_s16, [#allocation3], %s1884_s1, %s1884_s1, %s1885_s25  }
  0x25   :  { %s1886_s28 = smov [#allocation7]   ;;  %s1887_s30 = smov [#allocation8]  }
  0x26   :  { %s47_s29 = sshll.u32 %s1886_s28, 4  ;;  %s61_s8 = sshll.u32 %s1887_s30, 4  ;;  %s48_s29 = int_to_ptr.vmem [resolvable:$true] %s47_s29  ;;  %s1959_s8 = int_to_ptr.vmem [resolvable:$true] %s61_s8 }
  0x27   :  { %s1806_s13 = scalar_lea.hbm %s2023_s3, 4096 }
  0x28   :  { %p1807_p2 = scmp.ne.s32.totalorder %s2023_s3, %s1806_s13  ;;  %p1810_p3 = scmp.lt.u32.totalorder %s1806_s13, %s2023_s3 }
  0x2a   :  { %p1812_p4 = pnand %p1810_p3, %p1807_p2 }
  0x2c   :  { %1815 = shalt.err (!%p1812_p4)
}
  0x2d   :  { %s1816_s0 = scalar_lea.vmem %s48_s29, 4096  ;;  %p1821_p6 = scmp.lt.s32.totalorder %s48_s29, %s48_s29 }
  0x2e   :  { %p1817_p5 = scmp.ne.s32.totalorder %s48_s29, %s1816_s0  ;;  %p1822_p7 = scmp.lt.s32.totalorder %s1816_s0, %s1816_s0 }
  0x30   :  { %p1823_p8 = por %p1822_p7, %p1821_p6 }
  0x32   :  { %p1824_p9 = pnand %p1823_p8, %p1817_p5 }
  0x34   :  { %1827 = shalt.err (!%p1824_p9)
}
  0x35   :  { %53 = dma.hbm_to_vmem [thread:$0]  %s2023_s3, 4096, %s48_s29, [#allocation6], %s1881_s11, %s1881_s11, %s1882_s12  }
  0x36   :  { %s1828_s22 = scalar_lea.hbm %s2025_s5, 2048 }
  0x37   :  { %p1829_p10 = scmp.ne.s32.totalorder %s2025_s5, %s1828_s22  ;;  %p1832_p11 = scmp.lt.u32.totalorder %s1828_s22, %s2025_s5 }
  0x39   :  { %p1834_p12 = pnand %p1832_p11, %p1829_p10 }
  0x3b   :  { %1837 = shalt.err (!%p1834_p12)
}
  0x3c   :  { %s1838_s26 = scalar_lea.vmem %s1959_s8, 2048  ;;  %p1843_p0 = scmp.lt.s32.totalorder %s1959_s8, %s1959_s8 }
  0x3d   :  { %p1839_p13 = scmp.ne.s32.totalorder %s1959_s8, %s1838_s26  ;;  %p1844_p1 = scmp.lt.s32.totalorder %s1838_s26, %s1838_s26 }
  0x3f   :  { %p1845_p2 = por %p1844_p1, %p1843_p0 }
  0x41   :  { %p1846_p3 = pnand %p1845_p2, %p1839_p13 }
  0x43   :  { %1849 = shalt.err (!%p1846_p3)
}
  0x44   :  { %s1888_s3 = smov 64   ;;  %s1889_s11 = smov 4  }
  0x45   :  { %67 = dma.hbm_to_vmem [thread:$0]  %s2025_s5, 2048, %s1959_s8, [#allocation9], %s1888_s3, %s1888_s3, %s1889_s11  }
  0x46   :  { %1872 = dma.done.wait [#allocation3], 1792  }
  0x47   :  { %1873 = vsyncadd [#allocation3], 4294965504 }
  0x48   :  { %1874 = dma.done.wait [#allocation6], 16640  }
  0x49   :  { %1875 = vsyncadd [#allocation6], 4294950656 }
  0x4a   :  { %1876 = dma.done.wait [#allocation9], 2048  }
  0x4b   :  { %1877 = vsyncadd [#allocation9], 4294965248  ;;  %v1551_v0 = vld [vmem:[#allocation5 + $0x104] ss:$8 sps:$4 sm:$0xff]   ;;  %v1553_v1 = vld [vmem:[#allocation5 + $0x100] ss:$8 sps:$4 sm:$0xff]  }
  0x4c   :  { %751 = vmatprep.subr.bf16.mxu0 %v1551_v0  ;;  %v1554_v2 = vld [vmem:[#allocation5 + $0x114] ss:$8 sps:$4 sm:$0xff]   ;;  %v1556_v3 = vld [vmem:[#allocation5 + $0x110] ss:$8 sps:$4 sm:$0xff]   ;;  %v1557_v4 = vld [vmem:[#allocation5 + $0x124] ss:$8 sps:$4 sm:$0xff]  }
  0x4d   :  { %752 = vmatpush1.bf16.msra.mxu0 %v1553_v1  ;;  %v1559_v5 = vld [vmem:[#allocation5 + $0x120] ss:$8 sps:$4 sm:$0xff]   ;;  %v1560_v6 = vld [vmem:[#allocation5 + $0x134] ss:$8 sps:$4 sm:$0xff]   ;;  %v1562_v7 = vld [vmem:[#allocation5 + $0x130] ss:$8 sps:$4 sm:$0xff]  }
  0x4e   :  { %753 = vmatprep.subr.bf16.mxu0 %v1554_v2  ;;  %v1563_v8 = vld [vmem:[#allocation5 + $0x144] ss:$8 sps:$4 sm:$0xff]   ;;  %v1565_v9 = vld [vmem:[#allocation5 + $0x140] ss:$8 sps:$4 sm:$0xff]   ;;  %v1566_v10 = vld [vmem:[#allocation5 + $0x154] ss:$8 sps:$4 sm:$0xff]  }
  0x4f   :  { %v1568_v11 = vld [vmem:[#allocation5 + $0x150] ss:$8 sps:$4 sm:$0xff]   ;;  %v1569_v12 = vld [vmem:[#allocation5 + $0x164] ss:$8 sps:$4 sm:$0xff]   ;;  %v1571_v16 = vld [vmem:[#allocation5 + $0x160] ss:$8 sps:$4 sm:$0xff]  }
  0x50   :  { %v86_v13 = vld [vmem:[#allocation2 + $0x18] sm:$0xff]  ;;  %v93_v14 = vld [vmem:[#allocation2 + $0x50] sm:$0xff]  ;;  %v1572_v17 = vld [vmem:[#allocation5 + $0x174] ss:$8 sps:$4 sm:$0xff]   ;;  %vm704_vm0 = vcmask 130048   ;;  %s1891_s8 = smov [#allocation10]  }
  0x51   :  { %754 = vmatpush1.bf16.msra.mxu0 %v1556_v3  ;;  %v100_v15 = vpack.c.bf16 %v93_v14, %v86_v13  ;;  %v1605_v18 = vld [vmem:[#allocation5 + $0x4] ss:$8 sps:$4 sm:$0xff]   ;;  %v1574_v19 = vld [vmem:[#allocation5 + $0x170] ss:$8 sps:$4 sm:$0xff]   ;;  %v1610_v21 = vld [vmem:[#allocation5] ss:$8 sps:$4 sm:$0xff]  }
  0x52   :  { %755 = vmatprep.subr.bf16.mxu0 %v1557_v4  ;;  %v1575_v20 = vld [vmem:[#allocation5 + $0x184] ss:$8 sps:$4 sm:$0xff]   ;;  %708 = vmatprep.subr.bf16.mxu1 %v1605_v18  ;;  %v1611_v22 = vld [vmem:[#allocation5 + $0x14] ss:$8 sps:$4 sm:$0xff]   ;;  %v1577_v23 = vld [vmem:[#allocation5 + $0x180] ss:$8 sps:$4 sm:$0xff]  }
  0x53   :  { %783 = vmatprep.mubr.bf16.mxu0 %v100_v15  ;;  %709 = vmatpush1.bf16.msra.mxu1 %v1610_v21  ;;  %v1616_v24 = vld [vmem:[#allocation5 + $0x10] ss:$8 sps:$4 sm:$0xff]   ;;  %v1617_v25 = vld [vmem:[#allocation5 + $0x24] ss:$8 sps:$4 sm:$0xff]   ;;  %v1578_v26 = vld [vmem:[#allocation5 + $0x194] ss:$8 sps:$4 sm:$0xff]  }
  0x54   :  { %710 = vmatprep.subr.bf16.mxu1 %v1611_v22  ;;  %v1622_v27 = vld [vmem:[#allocation5 + $0x20] ss:$8 sps:$4 sm:$0xff]   ;;  %v1623_v28 = vld [vmem:[#allocation5 + $0x34] ss:$8 sps:$4 sm:$0xff]   ;;  %v1580_v29 = vld [vmem:[#allocation5 + $0x190] ss:$8 sps:$4 sm:$0xff]  }
  0x55   :  { %756 = vmatpush1.bf16.msra.mxu0 %v1559_v5  ;;  %v1581_v30 = vld [vmem:[#allocation5 + $0x1a4] ss:$8 sps:$4 sm:$0xff]   ;;  %v1628_v31 = vld [vmem:[#allocation5 + $0x30] ss:$8 sps:$4 sm:$0xff]   ;;  %v1583_v33 = vld [vmem:[#allocation5 + $0x1a0] ss:$8 sps:$4 sm:$0xff]  }
  0x56   :  { %757 = vmatprep.subr.bf16.mxu0 %v1560_v6  ;;  %v1629_v32 = vld [vmem:[#allocation5 + $0x44] ss:$8 sps:$4 sm:$0xff]   ;;  %v1584_v34 = vld [vmem:[#allocation5 + $0x1b4] ss:$8 sps:$4 sm:$0xff]   ;;  %v1634_v35 = vld [vmem:[#allocation5 + $0x40] ss:$8 sps:$4 sm:$0xff]  }
  0x57   :  { %711 = vmatpush1.bf16.msra.mxu1 %v1616_v24  ;;  %v1635_v36 = vld [vmem:[#allocation5 + $0x54] ss:$8 sps:$4 sm:$0xff]   ;;  %v1586_v37 = vld [vmem:[#allocation5 + $0x1b0] ss:$8 sps:$4 sm:$0xff]   ;;  %v1587_v38 = vld [vmem:[#allocation5 + $0x1c4] ss:$8 sps:$4 sm:$0xff]  }
  0x58   :  { %712 = vmatprep.subr.bf16.mxu1 %v1617_v25  ;;  %v1640_v39 = vld [vmem:[#allocation5 + $0x50] ss:$8 sps:$4 sm:$0xff]   ;;  %v1641_v40 = vld [vmem:[#allocation5 + $0x64] ss:$8 sps:$4 sm:$0xff]   ;;  %v1589_v41 = vld [vmem:[#allocation5 + $0x1c0] ss:$8 sps:$4 sm:$0xff]  }
  0x59   :  { %758 = vmatpush1.bf16.msra.mxu0 %v1562_v7  ;;  %v1590_v42 = vld [vmem:[#allocation5 + $0x1d4] ss:$8 sps:$4 sm:$0xff]   ;;  %v1646_v43 = vld [vmem:[#allocation5 + $0x60] ss:$8 sps:$4 sm:$0xff]   ;;  %v1592_v45 = vld [vmem:[#allocation5 + $0x1d0] ss:$8 sps:$4 sm:$0xff]  }
  0x5a   :  { %759 = vmatprep.subr.bf16.mxu0 %v1563_v8  ;;  %v1647_v44 = vld [vmem:[#allocation5 + $0x74] ss:$8 sps:$4 sm:$0xff]   ;;  %v1593_v46 = vld [vmem:[#allocation5 + $0x1e4] ss:$8 sps:$4 sm:$0xff]   ;;  %v1652_v47 = vld [vmem:[#allocation5 + $0x70] ss:$8 sps:$4 sm:$0xff]  }
  0x5b   :  { %713 = vmatpush1.bf16.msra.mxu1 %v1622_v27  ;;  %v1653_v48 = vld [vmem:[#allocation5 + $0x84] ss:$8 sps:$4 sm:$0xff]   ;;  %v1595_v49 = vld [vmem:[#allocation5 + $0x1e0] ss:$8 sps:$4 sm:$0xff]   ;;  %v1596_v50 = vld [vmem:[#allocation5 + $0x1f4] ss:$8 sps:$4 sm:$0xff]  }
  0x5c   :  { %714 = vmatprep.subr.bf16.mxu1 %v1623_v28  ;;  %v1658_v51 = vld [vmem:[#allocation5 + $0x80] ss:$8 sps:$4 sm:$0xff]   ;;  %v1659_v52 = vld [vmem:[#allocation5 + $0x94] ss:$8 sps:$4 sm:$0xff]   ;;  %v1598_v53 = vld [vmem:[#allocation5 + $0x1f0] ss:$8 sps:$4 sm:$0xff]  }
  0x5d   :  { %760 = vmatpush1.bf16.msra.mxu0 %v1565_v9  ;;  %v85_v54 = vld [vmem:[#allocation2 + $0x10] sm:$0xff]  ;;  %v92_v55 = vld [vmem:[#allocation2 + $0x48] sm:$0xff]  ;;  %v95_v62 = vld [vmem:[#allocation2 + $0x60] sm:$0xff]  ;;  %s1330_s9 = sshll.u32 %s1891_s8, 4  ;;  %s1331_s9 = int_to_ptr.vmem [resolvable:$true] %s1330_s9 }
  0x5e   :  { %761 = vmatprep.subr.bf16.mxu0 %v1566_v10  ;;  %v1601_v56 = vld [vmem:[#allocation5 + $0x204] ss:$8 sps:$4 sm:$0xff]   ;;  %v1664_v57 = vld [vmem:[#allocation5 + $0x90] ss:$8 sps:$4 sm:$0xff]   ;;  %v1599_v58 = vld [vmem:[#allocation5 + $0x200] ss:$8 sps:$4 sm:$0xff]   ;;  %v99_v59 = vpack.c.bf16 %v92_v55, %v85_v54  ;;  %p1855_p5 = scmp.lt.s32.totalorder %s1331_s9, %s1331_s9 }
  0x5f   :  { %715 = vmatpush1.bf16.msra.mxu1 %v1628_v31  ;;  %v1665_v60 = vld [vmem:[#allocation5 + $0xa4] ss:$8 sps:$4 sm:$0xff]   ;;  %v88_v61 = vld [vmem:[#allocation2 + $0x28] sm:$0xff]  ;;  %v1670_v1 = vld [vmem:[#allocation5 + $0xa0] ss:$8 sps:$4 sm:$0xff]   ;;  %s1850_s10 = scalar_lea.vmem %s1331_s9, 128 }
  0x60   :  { %716 = vmatprep.subr.bf16.mxu1 %v1629_v32  ;;  %v1604_v63 = vld [vmem:[#allocation5 + $0x214] ss:$8 sps:$4 sm:$0xff]   ;;  %v102_v0 = vpack.c.bf16 %v95_v62, %v88_v61  ;;  %v1602_v3 = vld [vmem:[#allocation5 + $0x210] ss:$8 sps:$4 sm:$0xff]   ;;  %v1609_v4 = vld [vmem:[#allocation5 + $0x224] ss:$8 sps:$4 sm:$0xff]   ;;  %p1851_p4 = scmp.ne.s32.totalorder %s1331_s9, %s1850_s10  ;;  %p1856_p6 = scmp.lt.s32.totalorder %s1850_s10, %s1850_s10 }
  0x61   :  { %762 = vmatpush1.bf16.msra.mxu0 %v1568_v11  ;;  %v1671_v2 = vld [vmem:[#allocation5 + $0xb4] ss:$8 sps:$4 sm:$0xff]   ;;  %v1676_v7 = vld [vmem:[#allocation5 + $0xb0] ss:$8 sps:$4 sm:$0xff]   ;;  %v1677_v9 = vld [vmem:[#allocation5 + $0xc4] ss:$8 sps:$4 sm:$0xff]  }
  0x62   :  { %763 = vmatprep.subr.bf16.mxu0 %v1569_v12  ;;  %v84_v5 = vld [vmem:[#allocation2 + $0x8] sm:$0xff]  ;;  %v91_v6 = vld [vmem:[#allocation2 + $0x40] sm:$0xff]  ;;  %v1607_v10 = vld [vmem:[#allocation5 + $0x220] ss:$8 sps:$4 sm:$0xff]   ;;  %p1857_p7 = por %p1856_p6, %p1855_p5 }
  0x63   :  { %717 = vmatpush1.bf16.msra.mxu1 %v1634_v35  ;;  %v98_v8 = vpack.c.bf16 %v91_v6, %v84_v5  ;;  %v1615_v11 = vld [vmem:[#allocation5 + $0x234] ss:$8 sps:$4 sm:$0xff]   ;;  %v1682_v12 = vld [vmem:[#allocation5 + $0xc0] ss:$8 sps:$4 sm:$0xff]   ;;  %v1613_v14 = vld [vmem:[#allocation5 + $0x230] ss:$8 sps:$4 sm:$0xff]  }
  0x64   :  { %718 = vmatprep.subr.bf16.mxu1 %v1635_v36  ;;  %v1683_v13 = vld [vmem:[#allocation5 + $0xd4] ss:$8 sps:$4 sm:$0xff]   ;;  %v1621_v15 = vld [vmem:[#allocation5 + $0x244] ss:$8 sps:$4 sm:$0xff]   ;;  %v1619_v18 = vld [vmem:[#allocation5 + $0x240] ss:$8 sps:$4 sm:$0xff]   ;;  %p1858_p8 = pnand %p1857_p7, %p1851_p4 }
  0x65   :  { %764 = vmatpush1.bf16.msra.mxu0 %v1571_v16  ;;  %740 = vmatprep.mubr.bf16.mxu1 %v98_v8  ;;  %v1688_v16 = vld [vmem:[#allocation5 + $0xd0] ss:$8 sps:$4 sm:$0xff]   ;;  %v1695_v21 = vld [vmem:[#allocation5 + $0xf4] ss:$8 sps:$4 sm:$0xff]   ;;  %v1631_v25 = vld [vmem:[#allocation5 + $0x260] ss:$8 sps:$4 sm:$0xff]  }
  0x66   :  { %765 = vmatprep.subr.bf16.mxu0 %v1572_v17  ;;  %v1689_v17 = vld [vmem:[#allocation5 + $0xe4] ss:$8 sps:$4 sm:$0xff]   ;;  %v1625_v22 = vld [vmem:[#allocation5 + $0x250] ss:$8 sps:$4 sm:$0xff]   ;;  %v1700_v28 = vld [vmem:[#allocation7 + $0x4] ss:$8 sps:$4 sm:$0xff]  }
  0x67   :  { %719 = vmatpush1.bf16.msra.mxu1 %v1640_v39  ;;  %v1697_v24 = vld [vmem:[#allocation5 + $0xf0] ss:$8 sps:$4 sm:$0xff]   ;;  %v90_v27 = vld [vmem:[#allocation2 + $0x38] sm:$0xff]  ;;  %v1706_v36 = vld [vmem:[#allocation7 + $0x24] ss:$8 sps:$4 sm:$0xff]  }
  0x68   :  { %720 = vmatprep.subr.bf16.mxu1 %v1641_v40  ;;  %v1703_v32 = vld [vmem:[#allocation7 + $0x14] ss:$8 sps:$4 sm:$0xff]   ;;  %v1701_v35 = vld [vmem:[#allocation7 + $0x10] ss:$8 sps:$4 sm:$0xff]   ;;  %v1704_v39 = vld [vmem:[#allocation7 + $0x20] ss:$8 sps:$4 sm:$0xff]  }
  0x69   :  { %766 = vmatpush1.bf16.msra.mxu0 %v1574_v19  ;;  %v1627_v19 = vld [vmem:[#allocation5 + $0x254] ss:$8 sps:$4 sm:$0xff]   ;;  %v1709_v40 = vld [vmem:[#allocation7 + $0x34] ss:$8 sps:$4 sm:$0xff]   ;;  %v1716_v55 = vld [vmem:[#allocation7 + $0x60] ss:$8 sps:$4 sm:$0xff]  }
  0x6a   :  { %767 = vmatprep.subr.bf16.mxu0 %v1575_v20  ;;  %v1694_v20 = vld [vmem:[#allocation5 + $0xe0] ss:$8 sps:$4 sm:$0xff]   ;;  %v1675_v54 = vld [vmem:[#allocation5 + $0x2d4] ss:$8 sps:$4 sm:$0xff]  }
  0x6b   :  { %721 = vmatpush1.bf16.msra.mxu1 %v1646_v43  ;;  %v1707_v43 = vld [vmem:[#allocation7 + $0x30] ss:$8 sps:$4 sm:$0xff]   ;;  %v1687_v62 = vld [vmem:[#allocation5 + $0x2f4] ss:$8 sps:$4 sm:$0xff]  }
  0x6c   :  { %722 = vmatprep.subr.bf16.mxu1 %v1647_v44  ;;  %v1712_v44 = vld [vmem:[#allocation7 + $0x44] ss:$8 sps:$4 sm:$0xff]   ;;  %v1679_v61 = vld [vmem:[#allocation5 + $0x2e0] ss:$8 sps:$4 sm:$0xff]  }
  0x6d   :  { %768 = vmatpush1.bf16.msra.mxu0 %v1577_v23  ;;  %v1633_v23 = vld [vmem:[#allocation5 + $0x264] ss:$8 sps:$4 sm:$0xff]   ;;  %v1725_v5 = vld [vmem:[#allocation7 + $0x90] ss:$8 sps:$4 sm:$0xff]  }
  0x6e   :  { %769 = vmatprep.subr.bf16.mxu0 %v1578_v26  ;;  %v83_v26 = vld [vmem:[#allocation2] sm:$0xff]  ;;  %v1691_v8 = vld [vmem:[#allocation5 + $0x300] ss:$8 sps:$4 sm:$0xff]  }
  0x6f   :  { %723 = vmatpush1.bf16.msra.mxu1 %v1652_v47  ;;  %v97_v31 = vpack.c.bf16 %v90_v27, %v83_v26  ;;  %v1710_v47 = vld [vmem:[#allocation7 + $0x40] ss:$8 sps:$4 sm:$0xff]  }
  0x70   :  { %724 = vmatprep.subr.bf16.mxu1 %v1653_v48  ;;  %v1715_v48 = vld [vmem:[#allocation7 + $0x54] ss:$8 sps:$4 sm:$0xff]  }
  0x71   :  { %770 = vmatpush1.bf16.msra.mxu0 %v1580_v29  ;;  %v1639_v29 = vld [vmem:[#allocation5 + $0x274] ss:$8 sps:$4 sm:$0xff]  }
  0x72   :  { %771 = vmatprep.subr.bf16.mxu0 %v1581_v30  ;;  %v1698_v30 = vld [vmem:[#allocation7] ss:$8 sps:$4 sm:$0xff]  }
  0x73   :  { %725 = vmatpush1.bf16.msra.mxu1 %v1658_v51  ;;  %v1713_v51 = vld [vmem:[#allocation7 + $0x50] ss:$8 sps:$4 sm:$0xff]  }
  0x74   :  { %726 = vmatprep.subr.bf16.mxu1 %v1659_v52  ;;  %v1718_v52 = vld [vmem:[#allocation7 + $0x64] ss:$8 sps:$4 sm:$0xff]  }
  0x75   :  { %772 = vmatpush1.bf16.msra.mxu0 %v1583_v33  ;;  %v1637_v33 = vld [vmem:[#allocation5 + $0x270] ss:$8 sps:$4 sm:$0xff]  }
  0x76   :  { %773 = vmatprep.subr.bf16.mxu0 %v1584_v34  ;;  %v1645_v34 = vld [vmem:[#allocation5 + $0x284] ss:$8 sps:$4 sm:$0xff]  }
  0x77   :  { %727 = vmatpush1.bf16.msra.mxu1 %v1664_v57  ;;  %v1673_v57 = vld [vmem:[#allocation5 + $0x2d0] ss:$8 sps:$4 sm:$0xff]  }
  0x78   :  { %728 = vmatprep.subr.bf16.mxu1 %v1665_v60  ;;  %v1724_v60 = vld [vmem:[#allocation7 + $0x84] ss:$8 sps:$4 sm:$0xff]  }
  0x79   :  { %774 = vmatpush1.bf16.msra.mxu0 %v1586_v37  ;;  %v1643_v37 = vld [vmem:[#allocation5 + $0x280] ss:$8 sps:$4 sm:$0xff]  }
  0x7a   :  { %775 = vmatprep.subr.bf16.mxu0 %v1587_v38  ;;  %v1651_v38 = vld [vmem:[#allocation5 + $0x294] ss:$8 sps:$4 sm:$0xff]  }
  0x7b   :  { %729 = vmatpush1.bf16.msra.mxu1 %v1670_v1  ;;  %v1685_v1 = vld [vmem:[#allocation5 + $0x2f0] ss:$8 sps:$4 sm:$0xff]  }
  0x7c   :  { %730 = vmatprep.subr.bf16.mxu1 %v1671_v2  ;;  %v87_v2 = vld [vmem:[#allocation2 + $0x20] sm:$0xff] }
  0x7d   :  { %776 = vmatpush1.bf16.msra.mxu0 %v1589_v41  ;;  %v1649_v41 = vld [vmem:[#allocation5 + $0x290] ss:$8 sps:$4 sm:$0xff]  }
  0x7e   :  { %777 = vmatprep.subr.bf16.mxu0 %v1590_v42  ;;  %v1657_v42 = vld [vmem:[#allocation5 + $0x2a4] ss:$8 sps:$4 sm:$0xff]  }
  0x7f   :  { %731 = vmatpush1.bf16.msra.mxu1 %v1676_v7  ;;  %v1730_v7 = vld [vmem:[#allocation7 + $0xa4] ss:$8 sps:$4 sm:$0xff]  }
  0x80   :  { %732 = vmatprep.subr.bf16.mxu1 %v1677_v9  ;;  %v1728_v9 = vld [vmem:[#allocation7 + $0xa0] ss:$8 sps:$4 sm:$0xff]  }
  0x81   :  { %778 = vmatpush1.bf16.msra.mxu0 %v1592_v45  ;;  %v1655_v45 = vld [vmem:[#allocation5 + $0x2a0] ss:$8 sps:$4 sm:$0xff]  }
  0x82   :  { %779 = vmatprep.subr.bf16.mxu0 %v1593_v46  ;;  %v1663_v46 = vld [vmem:[#allocation5 + $0x2b4] ss:$8 sps:$4 sm:$0xff]  }
  0x83   :  { %733 = vmatpush1.bf16.msra.mxu1 %v1682_v12  ;;  %v1731_v12 = vld [vmem:[#allocation7 + $0xb0] ss:$8 sps:$4 sm:$0xff]  }
  0x84   :  { %734 = vmatprep.subr.bf16.mxu1 %v1683_v13  ;;  %v1736_v13 = vld [vmem:[#allocation7 + $0xc4] ss:$8 sps:$4 sm:$0xff]  }
  0x85   :  { %780 = vmatpush1.bf16.msra.mxu0 %v1595_v49  ;;  %v1661_v49 = vld [vmem:[#allocation5 + $0x2b0] ss:$8 sps:$4 sm:$0xff]  }
  0x86   :  { %781 = vmatprep.subr.bf16.mxu0 %v1596_v50  ;;  %v1669_v50 = vld [vmem:[#allocation5 + $0x2c4] ss:$8 sps:$4 sm:$0xff]  }
  0x87   :  { %735 = vmatpush1.bf16.msra.mxu1 %v1688_v16  ;;  %v1734_v16 = vld [vmem:[#allocation7 + $0xc0] ss:$8 sps:$4 sm:$0xff]  }
  0x88   :  { %736 = vmatprep.subr.bf16.mxu1 %v1689_v17 }
  0x89   :  { %782 = vmatpush1.bf16.msra.mxu0 %v1598_v53  ;;  %v1667_v53 = vld [vmem:[#allocation5 + $0x2c0] ss:$8 sps:$4 sm:$0xff]  }
  0x8a   :  { %794 = vmatprep.subr.bf16.mxu0 %v1601_v56  ;;  %v1721_v56 = vld [vmem:[#allocation7 + $0x74] ss:$8 sps:$4 sm:$0xff]  }
  0x8b   :  { %737 = vmatpush1.bf16.msra.mxu1 %v1694_v20  ;;  %v1742_v20 = vld [vmem:[#allocation7 + $0xe4] ss:$8 sps:$4 sm:$0xff]  }
  0x8c   :  { %784 = vmatmul.mubr.bf16.vlgmr.msra.gmra.mrb[0].mxu0 %v99_v59  ;;  %738 = vmatprep.subr.bf16.mxu1 %v1695_v21  ;;  %v1719_v59 = vld [vmem:[#allocation7 + $0x70] ss:$8 sps:$4 sm:$0xff]   ;;  %v1740_v21 = vld [vmem:[#allocation7 + $0xe0] ss:$8 sps:$4 sm:$0xff]  }
  0x8d   :  { %795 = vmatpush1.bf16.msra.mxu0 %v1599_v58  ;;  %826 = vmatprep.mubr.bf16.mxu0 %v102_v0  ;;  %v1681_v58 = vld [vmem:[#allocation5 + $0x2e4] ss:$8 sps:$4 sm:$0xff]  }
  0x8e   :  { %796 = vmatprep.subr.bf16.mxu0 %v1604_v63  ;;  %v1722_v63 = vld [vmem:[#allocation7 + $0x80] ss:$8 sps:$4 sm:$0xff]   ;;  %v1727_v0 = vld [vmem:[#allocation7 + $0x94] ss:$8 sps:$4 sm:$0xff]  }
  0x8f   :  { %739 = vmatpush1.bf16.msra.mxu1 %v1697_v24  ;;  %v1746_v24 = vld [vmem:[#allocation8 + $0x40] sm:$0xff]  }
  0x90   :  { %1090 = vmatprep.subr.bf16.mxu1 %v1700_v28 }
  0x91   :  { %797 = vmatpush1.bf16.msra.mxu0 %v1602_v3  ;;  %v94_v3 = vld [vmem:[#allocation2 + $0x58] sm:$0xff] }
  0x92   :  { %798 = vmatprep.subr.bf16.mxu0 %v1609_v4  ;;  %741 = vmatmul.mubr.bf16.vlgmr.msra.gmra.mrb[0].mxu1 %v97_v31  ;;  %v1693_v4 = vld [vmem:[#allocation5 + $0x304] ss:$8 sps:$4 sm:$0xff]   ;;  %v101_v6 = vpack.c.bf16 %v94_v3, %v87_v2 }
  0x93   :  { %1091 = vmatpush1.bf16.msra.mxu1 %v1698_v30  ;;  %v1759_v2 = vld [vmem:[#allocation8 + $0x30] sm:$0xff]   ;;  %v1760_v3 = vld [vmem:[#allocation8 + $0x78] sm:$0xff]  }
  0x94   :  { %1092 = vmatprep.subr.bf16.mxu1 %v1703_v32  ;;  %v202_v32 = vld [vmem:[%s2022_s2] sm:$0x3] }
  0x95   :  { %799 = vmatpush1.bf16.msra.mxu0 %v1607_v10  ;;  %v1733_v10 = vld [vmem:[#allocation7 + $0xb4] ss:$8 sps:$4 sm:$0xff]  }
  0x96   :  { %800 = vmatprep.subr.bf16.mxu0 %v1615_v11  ;;  %v1890_v11 = vmov 0  }
  0x97   :  { %1093 = vmatpush1.bf16.msra.mxu1 %v1701_v35 }
  0x98   :  { %1094 = vmatprep.subr.bf16.mxu1 %v1706_v36 }
  0x99   :  { %801 = vmatpush1.bf16.msra.mxu0 %v1613_v14  ;;  %v89_v14 = vld [vmem:[#allocation2 + $0x30] sm:$0xff] }
  0x9a   :  { %802 = vmatprep.subr.bf16.mxu0 %v1621_v15  ;;  %v96_v15 = vld [vmem:[#allocation2 + $0x68] sm:$0xff] }
  0x9b   :  { %1095 = vmatpush1.bf16.msra.mxu1 %v1704_v39  ;;  %v103_v17 = vpack.c.bf16 %v96_v15, %v89_v14 }
  0x9c   :  { %1096 = vmatprep.subr.bf16.mxu1 %v1709_v40 }
  0x9d   :  { %803 = vmatpush1.bf16.msra.mxu0 %v1619_v18  ;;  %v1737_v18 = vld [vmem:[#allocation7 + $0xd0] ss:$8 sps:$4 sm:$0xff]  }
  0x9e   :  { %804 = vmatprep.subr.bf16.mxu0 %v1627_v19  ;;  %v1739_v19 = vld [vmem:[#allocation7 + $0xd4] ss:$8 sps:$4 sm:$0xff]  }
  0x9f   :  { %1097 = vmatpush1.bf16.msra.mxu1 %v1707_v43 }
  0xa0   :  { %1098 = vmatprep.subr.bf16.mxu1 %v1712_v44 }
  0xa1   :  { %805 = vmatpush1.bf16.msra.mxu0 %v1625_v22  ;;  %v1745_v22 = vld [vmem:[#allocation7 + $0xf4] ss:$8 sps:$4 sm:$0xff]  }
  0xa2   :  { %806 = vmatprep.subr.bf16.mxu0 %v1633_v23  ;;  %v1743_v23 = vld [vmem:[#allocation7 + $0xf0] ss:$8 sps:$4 sm:$0xff]  }
  0xa3   :  { %1099 = vmatpush1.bf16.msra.mxu1 %v1710_v47 }
  0xa4   :  { %1100 = vmatprep.subr.bf16.mxu1 %v1715_v48 }
  0xa5   :  { %807 = vmatpush1.bf16.msra.mxu0 %v1631_v25 }
  0xa6   :  { %808 = vmatprep.subr.bf16.mxu0 %v1639_v29  ;;  %v204_v29 = vlaneseq }
  0xa7   :  { %1101 = vmatpush1.bf16.msra.mxu1 %v1713_v51 }
  0xa8   :  { %1102 = vmatprep.subr.bf16.mxu1 %v1718_v52  ;;  %v205_v30 = vshrl.u32 %v204_v29, 7 }
  0xa9   :  { %809 = vmatpush1.bf16.msra.mxu0 %v1637_v33 }
  0xaa   :  { %810 = vmatprep.subr.bf16.mxu0 %v1645_v34  ;;  %v206_v31 = vsub.s32 0, %v205_v30  ;;  %v210_v33 = vsub.s32 1, %v205_v30 }
  0xab   :  { %1103 = vmatpush1.bf16.msra.mxu1 %v1716_v55  ;;  %v1748_v55 = vld [vmem:[#allocation8 + $0x48] sm:$0xff]  }
  0xac   :  { %1104 = vmatprep.subr.bf16.mxu1 %v1721_v56  ;;  %v207_v34 = vrot.slane %v202_v32, %v206_v31  ;;  %v211_v35 = vrot.slane %v202_v32, %v210_v33  ;;  %v1749_v56 = vld [vmem:[#allocation8 + $0x8] sm:$0xff]  }
  0xad   :  { %811 = vmatpush1.bf16.msra.mxu0 %v1643_v37 }
  0xae   :  { %812 = vmatprep.subr.bf16.mxu0 %v1651_v38 }
  0xaf   :  { %1105 = vmatpush1.bf16.msra.mxu1 %v1719_v59  ;;  %v1752_v59 = vld [vmem:[#allocation8 + $0x58] sm:$0xff]  }
  0xb0   :  { %1106 = vmatprep.subr.bf16.mxu1 %v1724_v60  ;;  %v1753_v60 = vld [vmem:[#allocation8 + $0x18] sm:$0xff]  }
  0xb1   :  { %813 = vmatpush1.bf16.msra.mxu0 %v1649_v41 }
  0xb2   :  { %814 = vmatprep.subr.bf16.mxu0 %v1657_v42 }
  0xb3   :  { %1107 = vmatpush1.bf16.msra.mxu1 %v1722_v63  ;;  %v1756_v63 = vld [vmem:[#allocation8 + $0x68] sm:$0xff]  }
  0xb4   :  { %1108 = vmatprep.subr.bf16.mxu1 %v1727_v0  ;;  %v1757_v0 = vld [vmem:[#allocation8 + $0x28] sm:$0xff]  }
  0xb5   :  { %815 = vmatpush1.bf16.msra.mxu0 %v1655_v45 }
  0xb6   :  { %816 = vmatprep.subr.bf16.mxu0 %v1663_v46 }
  0xb7   :  { %1109 = vmatpush1.bf16.msra.mxu1 %v1725_v5  ;;  %v918_v5 = vld [vmem:[%s2024_s4] sm:$0x3] }
  0xb8   :  { %1110 = vmatprep.subr.bf16.mxu1 %v1730_v7  ;;  %v927_v7 = vrot.slane %v918_v5, %v210_v33 }
  0xb9   :  { %817 = vmatpush1.bf16.msra.mxu0 %v1661_v49 }
  0xba   :  { %818 = vmatprep.subr.bf16.mxu0 %v1669_v50 }
  0xbb   :  { %1111 = vmatpush1.bf16.msra.mxu1 %v1728_v9 }
  0xbc   :  { %1112 = vmatprep.subr.bf16.mxu1 %v1733_v10 }
  0xbd   :  { %819 = vmatpush1.bf16.msra.mxu0 %v1667_v53 }
  0xbe   :  { %820 = vmatprep.subr.bf16.mxu0 %v1675_v54  ;;  %v1747_v54 = vld [vmem:[#allocation8] sm:$0xff]  }
  0xbf   :  { %1113 = vmatpush1.bf16.msra.mxu1 %v1731_v12 }
  0xc0   :  { %1114 = vmatprep.subr.bf16.mxu1 %v1736_v13 }
  0xc1   :  { %821 = vmatpush1.bf16.msra.mxu0 %v1673_v57  ;;  %v1750_v57 = vld [vmem:[#allocation8 + $0x50] sm:$0xff]  }
  0xc2   :  { %822 = vmatprep.subr.bf16.mxu0 %v1681_v58  ;;  %v1751_v58 = vld [vmem:[#allocation8 + $0x10] sm:$0xff]  }
  0xc3   :  { %1115 = vmatpush1.bf16.msra.mxu1 %v1734_v16 }
  0xc4   :  { %1116 = vmatprep.subr.bf16.mxu1 %v1739_v19 }
  0xc5   :  { %823 = vmatpush1.bf16.msra.mxu0 %v1679_v61  ;;  %v1754_v61 = vld [vmem:[#allocation8 + $0x60] sm:$0xff]  }
  0xc6   :  { %824 = vmatprep.subr.bf16.mxu0 %v1687_v62  ;;  %v1755_v62 = vld [vmem:[#allocation8 + $0x20] sm:$0xff]  }
  0xc7   :  { %1117 = vmatpush1.bf16.msra.mxu1 %v1737_v18 }
  0xc8   :  { %1118 = vmatprep.subr.bf16.mxu1 %v1742_v20 }
  0xc9   :  { %825 = vmatpush1.bf16.msra.mxu0 %v1685_v1  ;;  %v1758_v1 = vld [vmem:[#allocation8 + $0x70] sm:$0xff]  }
  0xca   :  { %837 = vmatprep.subr.bf16.mxu0 %v1693_v4  ;;  %v1761_v4 = vld [vmem:[#allocation8 + $0x38] sm:$0xff]  }
  0xcb   :  { %1119 = vmatpush1.bf16.msra.mxu1 %v1740_v21 }
  0xcc   :  { %827 = vmatmul.mubr.bf16.vlgmr.msra.gmra.mrb[0].mxu0 %v101_v6  ;;  %1120 = vmatprep.subr.bf16.mxu1 %v1745_v22  ;;  %v923_v6 = vrot.slane %v918_v5, %v206_v31 }
  0xcd   :  { %838 = vmatpush1.bf16.msra.mxu0 %v1691_v8  ;;  %869 = vmatprep.mubr.bf16.mxu0 %v1890_v11 }
  0xcf   :  { %1121 = vmatpush1.bf16.msra.mxu1 %v1743_v23 }
  0xd0   :  { %1501 = vmatprep.subr.bf16.mxu1 %v1746_v24 }
  0xd8   :  { %1442 = vmatmul.mubr.msk.bf16.vlgmr.msra.gmra.mrb[0].mxu0 %vm704_vm0, %v103_v17 }
 0x165   :  { %v742_v25 = vpop.f32.mrb[0].mxu1 }
 0x166   :  { %v744_v26 = vpop.f32.mrb[1].mxu1  ;;  %v743_v36 = vadd.f32 %v742_v25, %v207_v34 }
 0x167   :  { %v746_v27 = vpop.f32.mrb[2].mxu1  ;;  %v745_v37 = vadd.f32 %v744_v26, %v211_v35  ;;  %v1475_v26 = vld [vmem:[%s2026_s6] ss:$0 sm:$0xff] }
 0x168   :  { %v748_v28 = vpop.f32.mrb[3].mxu1  ;;  %v747_v39 = vadd.f32 %v746_v27, %v207_v34 }
 0x169   :  { %v749_v42 = vadd.f32 %v748_v28, %v211_v35 }
 0x1ab   :  { %v871_v38 = vpop.f32.mrb[0].mxu0 }
 0x1ac   :  { %v1524_v40 = vadd.f32 %v871_v38, %v743_v36  ;;  %v873_v41 = vpop.f32.mrb[1].mxu0 }
 0x1ad   :  { %v1526_v43 = vadd.f32 %v873_v41, %v745_v37  ;;  %v875_v44 = vpop.f32.mrb[2].mxu0 }
 0x1ae   :  { %v1528_v45 = vadd.f32 %v875_v44, %v747_v39  ;;  %v877_v46 = vpop.f32.mrb[3].mxu0  ;;  %v880_v48 = vmax.f32 %v1524_v40, 0.0 }
 0x1af   :  { %v1530_v47 = vadd.f32 %v877_v46, %v749_v42  ;;  %v881_v50 = vmax.f32 %v1526_v43, 0.0 }
 0x1b0   :  { %v882_v49 = vmax.f32 %v1528_v45, 0.0 }
 0x1b1   :  { %v883_v51 = vmax.f32 %v1530_v47, 0.0 }
 0x1b2   :  { %v884_v52 = vpack.c.bf16 %v882_v49, %v880_v48 }
 0x1b3   :  { %v885_v53 = vpack.c.bf16 %v883_v51, %v881_v50 }
 0x1b5   :  { %1122 = vmatprep.mubr.bf16.mxu1 %v885_v53 }
 0x1b6   :  { %1123 = vmatmul.mubr.bf16.vlgmr.msra.gmra.mrb[4].mxu1 %v884_v52 }
 0x1b7   :  { %1502 = vmatpush3.bf16.msra.mxu1 %v1747_v54 }
 0x1b8   :  { %1503 = vmatprep.subr.bf16.mxu1 %v1748_v55 }
 0x1bb   :  { %1504 = vmatpush3.bf16.msra.mxu1 %v1749_v56 }
 0x1bc   :  { %1505 = vmatprep.subr.bf16.mxu1 %v1750_v57 }
 0x1bf   :  { %1506 = vmatpush3.bf16.msra.mxu1 %v1751_v58 }
 0x1c0   :  { %1507 = vmatprep.subr.bf16.mxu1 %v1752_v59 }
 0x1c3   :  { %1508 = vmatpush3.bf16.msra.mxu1 %v1753_v60 }
 0x1c4   :  { %1509 = vmatprep.subr.bf16.mxu1 %v1754_v61 }
 0x1c7   :  { %1510 = vmatpush3.bf16.msra.mxu1 %v1755_v62 }
 0x1c8   :  { %1511 = vmatprep.subr.bf16.mxu1 %v1756_v63 }
 0x1cb   :  { %1512 = vmatpush3.bf16.msra.mxu1 %v1757_v0 }
 0x1cc   :  { %1513 = vmatprep.subr.bf16.mxu1 %v1758_v1 }
 0x1cf   :  { %1514 = vmatpush3.bf16.msra.mxu1 %v1759_v2 }
 0x1d0   :  { %1515 = vmatprep.subr.bf16.mxu1 %v1760_v3 }
 0x1d3   :  { %1516 = vmatpush3.bf16.msra.mxu1 %v1761_v4 }
 0x289   :  { %v1124_v8 = vpop.f32.mrb[4].mxu1 }
 0x28a   :  { %v1125_v9 = vadd.f32 %v1124_v8, %v923_v6  ;;  %v1126_v10 = vpop.f32.mrb[5].mxu1 }
 0x28b   :  { %v1127_v11 = vadd.f32 %v1126_v10, %v927_v7  ;;  %v1128_v12 = vpop.f32.mrb[6].mxu1 }
 0x28c   :  { %v1129_v13 = vadd.f32 %v1128_v12, %v923_v6  ;;  %v1130_v14 = vpop.f32.mrb[7].mxu1  ;;  %v1133_v16 = vmax.f32 %v1125_v9, 0.0 }
 0x28d   :  { %v1131_v15 = vadd.f32 %v1130_v14, %v927_v7  ;;  %v1134_v18 = vmax.f32 %v1127_v11, 0.0 }
 0x28e   :  { %v1135_v17 = vmax.f32 %v1129_v13, 0.0 }
 0x28f   :  { %v1136_v19 = vmax.f32 %v1131_v15, 0.0 }
 0x290   :  { %v1137_v20 = vpack.c.bf16 %v1135_v17, %v1133_v16 }
 0x291   :  { %v1138_v21 = vpack.c.bf16 %v1136_v19, %v1134_v18 }
 0x293   :  { %1306 = vmatprep.mubr.bf16.mxu1 %v1138_v21 }
 0x294   :  { %1307 = vmatmul.mubr.bf16.vlgmr.msra.gmra.mrb[8].mxu1 %v1137_v20 }
 0x367   :  { %v1517_v22 = vpop.f32.mrb[8].mxu1 }
 0x368   :  { %v1518_v23 = vpop.f32.mrb[9].mxu1 }
 0x369   :  { %v1519_v24 = vadd.f32 %v1518_v23, %v1517_v22  ;;  %v1520_v25 = vpop.f32.mrb[10].mxu1 }
 0x36a   :  { %v1521_v27 = vpop.f32.mrb[11].mxu1 }
 0x36b   :  { %v1522_v28 = vadd.f32 %v1521_v27, %v1520_v25  ;;  %v1309_v29 = vadd.f32 %v1519_v24, %v1475_v26 }
 0x36d   :  { %v1312_v30 = vadd.f32 %v1522_v28, %v1475_v26 }
 0x36f   :  { %v1499_v31 = vpack.c.bf16 %v1312_v30, %v1309_v29 }
 0x371   :  { %1500 = vst [vmem:[#allocation10] sm:$0xff] %v1499_v31  }
 0x372   :  { %1861 = shalt.err (!%p1858_p8)
}
 0x373   :  { %s1862_s6 = scalar_lea.hbm %s2027_s7, 128 }
 0x374   :  { %p1863_p9 = scmp.ne.s32.totalorder %s2027_s7, %s1862_s6  ;;  %p1866_p10 = scmp.lt.u32.totalorder %s1862_s6, %s2027_s7 }
 0x376   :  { %p1868_p11 = pnand %p1866_p10, %p1863_p9 }
 0x378   :  { %1871 = shalt.err (!%p1868_p11)
}
 0x379   :  { %1336 = dma.vmem_to_hbm [thread:$0]  %s1331_s9, 128, %s2027_s7, [#allocation4], %s1888_s3, %s1888_s3, %s1889_s11  }
 0x37a   :  { %1878 = dma.done.wait [#allocation4], 128  }
 0x37b   :  { %1879 = vsyncadd [#allocation4], 4294967168 }
 0x37c   :  { %1340 = vsyncpa [#allocation3], 1 }
 0x37d   :  { %1341 = vsyncpa [#allocation6], 1 }
 0x37e   :  { %1342 = vsyncpa [#allocation9], 1 }
 0x37f   :  { %1343 = vsyncpa [#allocation4], 1 }

</bundles_post_ra>
